<compile_context>
chip_gen: v5e
topology: v5e:2x2
jax: 0.10.0
libtpu: 0.0.40
codegen_flags: <defaults>
</compile_context>

<pallas_src>
import functools

import jax
import jax.numpy as jnp
from jax.experimental import pallas as pl
from jax.experimental.pallas import tpu as pltpu


def _rmsnorm_kernel(x_ref, w_ref, o_ref, *, eps, inv_h, downcast_before_weight):
    # x_ref: (tm, H) tile of hidden_states, w_ref: (1, H) weight, o_ref: (tm, H)
    x_f32 = x_ref[...].astype(jnp.float32)                       # .to(torch.float32)
    var = jnp.sum(x_f32 * x_f32, axis=-1, keepdims=True) * inv_h  # mean via sum*(1/H)
    inv = jax.lax.rsqrt(var + eps)                                # torch.rsqrt(var+eps)
    y = x_f32 * inv
    if downcast_before_weight:
        # torch: hidden_states.to(weight.dtype) happens BEFORE `weight * hidden`
        y = y.astype(o_ref.dtype)
        o_ref[...] = (w_ref[...] * y).astype(o_ref.dtype)
    else:
        o_ref[...] = (w_ref[...].astype(jnp.float32) * y).astype(o_ref.dtype)


def _sublane_multiple(dtype):
    # full-vreg sublane packing: 8 for 4-byte, 16 for 2-byte, 32 for 1-byte dtypes
    return max(8, 32 // jnp.dtype(dtype).itemsize)


def _tpu_vmem_and_cores():
    """(vmem_capacity_bytes, tensorcores_per_chip) with safe fallbacks."""
    vmem_cap = 64 << 20            # conservative default (v7x per-TC)
    num_tc = 1
    try:
        info = pltpu.get_tpu_info()
        cap = getattr(info, "vmem_capacity_bytes", None)
        if cap:
            vmem_cap = int(cap)
        num_tc = 0
        for name in ("num_tensorcores", "tensor_cores_per_chip",
                     "num_cores", "cores_per_chip"):
            val = getattr(info, name, None)
            if val:
                num_tc = int(val)
                break
        if not num_tc:
            # heuristic: 64 MiB/TC parts (v7x) have 2 TCs; 128 MiB parts have 1
            num_tc = 2 if vmem_cap <= (64 << 20) else 1
    except Exception:
        vmem_cap, num_tc = 64 << 20, 1
    vmem_cap = max(32 << 20, min(vmem_cap, 128 << 20))
    return vmem_cap, max(1, num_tc)


def llama_rmsnorm(hidden_states, weight, eps=1e-6):
    """Pallas RMSNorm. hidden_states: (..., H), weight: (H,)."""
    orig_shape = hidden_states.shape
    H = orig_shape[-1]
    x2d = hidden_states.reshape(-1, H)
    rows = x2d.shape[0]

    # Output dtype follows PyTorch semantics (clamped to f32 — no f64 on TPU).
    w_is_low_precision = weight.dtype in (jnp.float16, jnp.bfloat16)
    out_dtype = weight.dtype if w_is_low_precision else jnp.float32

    in_item = jnp.dtype(x2d.dtype).itemsize
    out_item = jnp.dtype(out_dtype).itemsize
    w_item = jnp.dtype(weight.dtype).itemsize

    # ---- row tile (tm) sizing ---------------------------------------------
    pack = _sublane_multiple(x2d.dtype)
    vmem_cap, num_tc = _tpu_vmem_and_cores()

    bytes_per_row = H * (in_item + out_item)
    # Budget for the double-buffered (in + out) working set: ~62% of VMEM
    # (~40 MiB on v7x / 64 MiB per TC, ~80 MiB on v5e & v6e / 128 MiB).
    ws_budget = min(int(vmem_cap * 0.625), 96 << 20)
    tm_budget = max(pack, ((ws_budget // (2 * bytes_per_row)) // pack) * pack)

    # ~16 MiB input-tile target (pure HBM-streaming; amortize ~0.35us/step).
    tm = (16 << 20) // max(1, H * in_item)
    tm = max(pack, (tm // pack) * pack)
    tm = min(tm, tm_budget)

    if tm >= rows:
        # Whole tensor fits in one tile.
        if num_tc >= 2 and rows >= 2 * pack:
            # 2-TC chips (v7x): split evenly across both TensorCores.
            half = (rows + 1) // 2
            tm = max(pack, (-(-half // pack)) * pack)
        else:
            tm = rows                    # single block; dims equal the full array
    elif num_tc >= 2:
        # 2-TC chips: prefer an even grid so both TensorCores stay busy.
        n_tiles = -(-rows // tm)
        if n_tiles % 2:
            tm_even = -(-rows // (n_tiles + 1))
            tm_even = max(pack, (-(-tm_even // pack)) * pack)
            tm = min(tm, tm_even)

    n_tiles = -(-rows // tm)             # ceil-div; last block may be ragged (masked)

    # ---- explicit VMEM budget sized to the chosen tiles ---------------------
    est = 2 * tm * bytes_per_row + 2 * H * w_item
    vmem_cap_limit = min(int(vmem_cap * 0.75), 100 << 20)
    vmem_limit = int(min(max(est + (4 << 20), 32 << 20), vmem_cap_limit))

    w2d = weight.reshape(1, H)

    cost = pl.CostEstimate(
        flops=4 * rows * H,
        transcendentals=rows,
        bytes_accessed=rows * H * (in_item + out_item) + H * w_item,
    )

    out = pl.pallas_call(
        functools.partial(
            _rmsnorm_kernel,
            eps=float(eps),
            inv_h=1.0 / float(H),
            downcast_before_weight=w_is_low_precision,
        ),
        out_shape=jax.ShapeDtypeStruct((rows, H), out_dtype),
        grid_spec=pltpu.PrefetchScalarGridSpec(
            num_scalar_prefetch=0,
            grid=(n_tiles,),
            in_specs=[
                pl.BlockSpec((tm, H), lambda i: (i, 0)),   # hidden_states tile
                pl.BlockSpec((1, H), lambda i: (0, 0)),    # weight (broadcast)
            ],
            out_specs=pl.BlockSpec((tm, H), lambda i: (i, 0)),
        ),
        compiler_params=pltpu.CompilerParams(
            dimension_semantics=("parallel",),
            vmem_limit_bytes=vmem_limit,
        ),
        cost_estimate=cost,
    )(x2d, w2d)

    return out.reshape(orig_shape)


def _reference_rmsnorm(x, w, eps=1e-6):
    xf = x.astype(jnp.float32)
    var = jnp.mean(xf * xf, axis=-1, keepdims=True)
    h = xf * jax.lax.rsqrt(var + eps)
    if w.dtype in (jnp.float16, jnp.bfloat16):
        h = h.astype(w.dtype)
    return w * h


if __name__ == "__main__":
    key = jax.random.PRNGKey(0)

    # --- main test: f32 weights / f32 activations (module default: ones weight) ---
    batch, seq, hidden = 2, 8, 128
    k1, k2 = jax.random.split(key)
    x = jax.random.normal(k1, (batch, seq, hidden), dtype=jnp.float32)
    weight = jnp.ones((hidden,), dtype=jnp.float32)

    out = llama_rmsnorm(x, weight, eps=1e-6)
    out = jax.block_until_ready(out)
    ref = _reference_rmsnorm(x, weight, eps=1e-6)
    assert out.shape == x.shape, (out.shape, x.shape)
    assert out.dtype == ref.dtype, (out.dtype, ref.dtype)
    assert jnp.allclose(out, ref, atol=1e-5, rtol=1e-5), "f32 mismatch vs reference"

    # --- ragged + low-precision test: rows not a multiple of the sublane pack,
    #     H not a multiple of 128, and the downcast-before-weight path (bf16) ---
    b2, s2, h2 = 3, 5, 96
    x_bf = jax.random.normal(k2, (b2, s2, h2), dtype=jnp.float32).astype(jnp.bfloat16)
    w_bf = (1.0 + 0.1 * jax.random.normal(key, (h2,), dtype=jnp.float32)).astype(jnp.bfloat16)

    out_bf = llama_rmsnorm(x_bf, w_bf, eps=1e-6)
    out_bf = jax.block_until_ready(out_bf)
    ref_bf = _reference_rmsnorm(x_bf, w_bf, eps=1e-6)
    assert out_bf.shape == x_bf.shape
    assert out_bf.dtype == jnp.bfloat16, out_bf.dtype
    assert jnp.allclose(out_bf.astype(jnp.float32), ref_bf.astype(jnp.float32),
                        atol=2e-2, rtol=2e-2), "bf16 mismatch vs reference"

    print("KERNEL_OK")
</pallas_src>

<mosaic_0001>
module attributes {stable_mosaic.version = 11 : i64} {
  func.func @_rmsnorm_kernel(%arg0: i32, %arg1: memref<16x128xf32, #tpu.memory_space<vmem>>, %arg2: memref<1x128xf32, #tpu.memory_space<vmem>>, %arg3: memref<16x128xf32, #tpu.memory_space<vmem>>) attributes {dimension_semantics = [#tpu.dimension_semantics<parallel>], iteration_bounds = array<i64: 1>, scalar_prefetch = 0 : i64, scratch_operands = 0 : i64, tpu.core_type = #tpu.core_type<tc>, window_params = [{transform_indices = @transform_0, window_bounds = array<i64: 16, 128>}, {pipeline_mode = #tpu.pipeline_mode<synchronous>, transform_indices = @transform_1, window_bounds = array<i64: 1, 128>}, {transform_indices = @transform_2, window_bounds = array<i64: 16, 128>}]} {
    %c0 = arith.constant 0 : index
    %c0_0 = arith.constant 0 : index
    %0 = vector.load %arg1[%c0, %c0_0] : memref<16x128xf32, #tpu.memory_space<vmem>>, vector<16x128xf32>
    %1 = arith.mulf %0, %0 : vector<16x128xf32>
    %cst = arith.constant dense<0.000000e+00> : vector<16xf32>
    %2 = vector.multi_reduction <add>, %1, %cst [1] : vector<16x128xf32> to vector<16xf32>
    %3 = vector.shape_cast %2 : vector<16xf32> to vector<16x1xf32>
    %cst_1 = arith.constant 7.812500e-03 : f32
    %4 = vector.broadcast %cst_1 : f32 to vector<16x1xf32>
    %5 = arith.mulf %3, %4 : vector<16x1xf32>
    %cst_2 = arith.constant 9.99999997E-7 : f32
    %6 = vector.broadcast %cst_2 : f32 to vector<16x1xf32>
    %7 = arith.addf %5, %6 : vector<16x1xf32>
    %8 = math.rsqrt %7 : vector<16x1xf32>
    %9 = vector.broadcast %8 : vector<16x1xf32> to vector<16x128xf32>
    %10 = arith.mulf %0, %9 : vector<16x128xf32>
    %c0_3 = arith.constant 0 : index
    %c0_4 = arith.constant 0 : index
    %11 = vector.load %arg2[%c0_3, %c0_4] : memref<1x128xf32, #tpu.memory_space<vmem>>, vector<1x128xf32>
    %12 = vector.broadcast %11 : vector<1x128xf32> to vector<16x128xf32>
    %13 = arith.mulf %12, %10 : vector<16x128xf32>
    %c0_5 = arith.constant 0 : index
    %c0_6 = arith.constant 0 : index
    %14 = vector.load %arg3[%c0_5, %c0_6] : memref<16x128xf32, #tpu.memory_space<vmem>>, vector<16x128xf32>
    tpu.vector_store %arg3[%c0_5, %c0_6], %13 {strides = array<i32>} : memref<16x128xf32, #tpu.memory_space<vmem>>, vector<16x128xf32>,
    return
  }
  func.func @transform_0(%arg0: i32) -> (i32, i32) {
    %c0_i32 = arith.constant 0 : i32
    %c0_i32_0 = arith.constant 0 : i32
    return %arg0, %c0_i32 : i32, i32
  }
  func.func @transform_1(%arg0: i32) -> (i32, i32) {
    %c0_i32 = arith.constant 0 : i32
    %c0_i32_0 = arith.constant 0 : i32
    %c0_i32_1 = arith.constant 0 : i32
    return %c0_i32, %c0_i32_0 : i32, i32
  }
  func.func @transform_2(%arg0: i32) -> (i32, i32) {
    %c0_i32 = arith.constant 0 : i32
    %c0_i32_0 = arith.constant 0 : i32
    return %arg0, %c0_i32 : i32, i32
  }
}

</mosaic_0001>

<bundles_post_ra>
// kernel: tpu_custom_call.1
= control target key start
LH: loop header
LB: loop body
LE: loop exit
PB: predicated region body
PF: predicated region fallthrough
CT: control target
= control target key end

     0   :  { %7 = vsyncpa [#allocation3], 0  ;;  %s227_s0 = inlined_call_operand.hbm [shape: f32[16,128], index: 0, kind: input, shape index: {}]   ;;  %s228_s1 = inlined_call_operand.hbm [shape: f32[1,128], index: 1, kind: input, shape index: {}]   ;;  %s229_s2 = inlined_call_operand.hbm [shape: f32[16,128], index: 2, kind: output, shape index: {}]  }
   0x1   :  { %8 = vsyncpa [#allocation6], 0 }
   0x2   :  { %9 = vsyncpa [#allocation4], 0  ;;  %s14_s11 = sshll.u32 %s227_s0, 4  ;;  %s192_s12 = smov [#allocation2]   ;;  %s15_s11 = int_to_ptr.hbm [resolvable:$true] %s14_s11 }
   0x3   :  { %s16_s13 = sshll.u32 %s192_s12, 4  ;;  %s28_s16 = sshll.u32 %s228_s1, 4  ;;  %s17_s13 = int_to_ptr.vmem [resolvable:$true] %s16_s13  ;;  %s29_s16 = int_to_ptr.hbm [resolvable:$true] %s28_s16 }
   0x4   :  { %s193_s17 = smov 128   ;;  %s194_s18 = smov 8  }
   0x5   :  { %22 = dma.hbm_to_vmem [thread:$0]  %s15_s11, 256, %s17_s13, [#allocation3], %s193_s17, %s193_s17, %s194_s18  }
   0x6   :  { %s195_s19 = smov [#allocation5]  }
   0x7   :  { %s30_s20 = sshll.u32 %s195_s19, 4  ;;  %s31_s20 = int_to_ptr.vmem [resolvable:$true] %s30_s20 }
   0x8   :  { %33 = dma.hbm_to_vmem [thread:$0]  %s29_s16, 16, %s31_s20, [#allocation6]  }
   0x9   :  { %186 = dma.done.wait [#allocation3], 256  }
   0xa   :  { %187 = vsyncadd [#allocation3], 4294967040 }
   0xb   :  { %188 = dma.done.wait [#allocation6], 16  }
   0xc   :  { %189 = vsyncadd [#allocation6], 4294967280  ;;  %v42_v0 = vld [vmem:[#allocation2] sm:$0xff]  ;;  %v43_v2 = vld [vmem:[#allocation2 + $0x8] sm:$0xff]  ;;  %s196_s0 = smov [#allocation7]   ;;  %s90_s23 = sshll.u32 %s229_s2, 4  ;;  %s91_s23 = int_to_ptr.hbm [resolvable:$true] %s90_s23 }
   0xd   :  { %v44_v1 = vmul.f32 %v42_v0, %v42_v0  ;;  %v45_v3 = vmul.f32 %v43_v2, %v43_v2  ;;  %v109_v18 = vld [vmem:[#allocation5] ss:$0 sm:$0xff]  ;;  %s88_s1 = sshll.u32 %s196_s0, 4  ;;  %s89_s1 = int_to_ptr.vmem [resolvable:$true] %s88_s1 }
   0xf   :  { %46 = vadd.xlane.f32.xlu0 %v44_v1 }
  0x17   :  { %48 = vadd.xlane.f32.xlu0 %v45_v3 }
  0x82   :  { %v47_v4 = vpop.xlane.xlu0 %46 }
  0x83   :  { %v50_v5 = vmul.f32 0.0078125, %v47_v4 }
  0x85   :  { %v52_v6 = vadd.f32 1e-06, %v50_v5 }
  0x87   :  { %110 = vrsqrt.f32 %v52_v6  ;;  %vm60_vm1 = vweird.f32 %v52_v6 }
  0x8a   :  { %v49_v7 = vpop.xlane.xlu0 %48 }
  0x8b   :  { %v51_v8 = vmul.f32 0.0078125, %v49_v7 }
  0x8d   :  { %v111_v9 = vpop.eup %110  ;;  %v53_v10 = vadd.f32 1e-06, %v51_v8 }
  0x8e   :  { %v55_v11 = vmul.f32 %v111_v9, %v52_v6  ;;  %vm61_vm0 = vweird.f32 %v111_v9 }
  0x8f   :  { %112 = vrsqrt.f32 %v53_v10  ;;  %vm62_vm2 = vmor %vm60_vm1, %vm61_vm0  ;;  %vm70_vm4 = vweird.f32 %v53_v10 }
  0x90   :  { %v56_v12 = vmul.f32 %v111_v9, %v55_v11 }
  0x92   :  { %v57_v13 = vmul.f32 0.5, %v56_v12 }
  0x94   :  { %v58_v14 = vsub.f32 1.5, %v57_v13 }
  0x95   :  { %v113_v15 = vpop.eup %112 }
  0x96   :  { %v59_v16 = vmul.f32 %v111_v9, %v58_v14  ;;  %v65_v17 = vmul.f32 %v113_v15, %v53_v10  ;;  %vm71_vm3 = vweird.f32 %v113_v15 }
  0x97   :  { %vm72_vm5 = vmor %vm70_vm4, %vm71_vm3 }
  0x98   :  { %v63_v19 = vsel %vm62_vm2, %v111_v9, %v59_v16  ;;  %v66_v20 = vmul.f32 %v113_v15, %v65_v17 }
  0x99   :  { %v74_v21 = vmul.f32 %v63_v19, %v42_v0 }
  0x9a   :  { %v67_v22 = vmul.f32 0.5, %v66_v20 }
  0x9b   :  { %v80_v23 = vmul.f32 %v109_v18, %v74_v21 }
  0x9c   :  { %v68_v24 = vsub.f32 1.5, %v67_v22 }
  0x9d   :  { %82 = vst [vmem:[#allocation7] sm:$0xff] %v80_v23 }
  0x9e   :  { %v69_v25 = vmul.f32 %v113_v15, %v68_v24 }
  0xa0   :  { %v73_v26 = vsel %vm72_vm5, %v113_v15, %v69_v25 }
  0xa1   :  { %v75_v27 = vmul.f32 %v73_v26, %v43_v2 }
  0xa3   :  { %v81_v28 = vmul.f32 %v109_v18, %v75_v27 }
  0xa5   :  { %83 = vst [vmem:[#allocation7 + $0x8] sm:$0xff] %v81_v28 }
  0xa6   :  { %96 = dma.vmem_to_hbm [thread:$0]  %s89_s1, 256, %s91_s23, [#allocation4], %s193_s17, %s193_s17, %s194_s18  }
  0xa7   :  { %190 = dma.done.wait [#allocation4], 256  }
  0xa8   :  { %191 = vsyncadd [#allocation4], 4294967040 }
  0xa9   :  { %101 = vsyncpa [#allocation3], 1 }
  0xaa   :  { %102 = vsyncpa [#allocation6], 1 }
  0xab   :  { %103 = vsyncpa [#allocation4], 1 }

</bundles_post_ra>
